<compile_context>
chip_gen: v5e
topology: v5e:2x2
jax: 0.10.0
libtpu: 0.0.40
codegen_flags: <defaults>
</compile_context>

<pallas_src>
import functools

import jax
import jax.numpy as jnp
from jax.experimental import pallas as pl
from jax.experimental.pallas import tpu as pltpu


def _round_up(x, m):
    return (x + m - 1) // m * m


def _cdiv(a, b):
    return (a + b - 1) // b


# ---------------------------------------------------------------------------
# Generation-aware configuration (VMEM budget, TC count)
# ---------------------------------------------------------------------------
def _tpu_config():
    vmem_cap = 64 * 1024 * 1024
    try:
        info = pltpu.get_tpu_info()
        vmem_cap = int(getattr(info, "vmem_capacity_bytes", vmem_cap))
    except Exception:
        pass
    if vmem_cap >= 100 * 1024 * 1024:
        # v5e / v6e class: 128 MiB physical VMEM, single TensorCore per chip.
        return dict(big_vmem=True, num_tc=1, max_tm=2048,
                    tile_budget=48 * 1024 * 1024,
                    vmem_limit=64 * 1024 * 1024)
    # v7x class: 64 MiB VMEM per TensorCore, 2 TensorCores per chip.
    return dict(big_vmem=False, num_tc=2, max_tm=1024,
                tile_budget=20 * 1024 * 1024,
                vmem_limit=32 * 1024 * 1024)


def _pick_tm(M, Kdim, Cout_pad, cfg):
    """Pick the M (lane-axis) tile: as big as the VMEM budget allows."""
    tm = min(cfg["max_tm"], _round_up(M, 128))
    # Split M across >=2 tiles only when 2 TensorCores exist (v7x megacore);
    # on v5e/v6e the grid is a serial loop and splitting only adds per-step cost.
    if cfg["num_tc"] >= 2 and M > 128 and _cdiv(M, tm) < 2:
        tm = _round_up(_cdiv(M, 2), 128)

    def est(tm_):
        kd = _round_up(Kdim, 16)
        return (2 * kd * tm_ * 2                          # bf16 patches^T, double buffered
                + 2 * Cout_pad * tm_ * 4                  # f32 y^T, double buffered
                + 2 * Cout_pad * _round_up(Kdim, 128) * 2 # bf16 W^T (resident; over-counted)
                + 4 * Cout_pad * 128 * 4)                 # partial-stat blocks

    while tm > 128 and est(tm) > cfg["tile_budget"]:
        tm = max(128, _round_up(tm // 2, 128))
    return tm


# ---------------------------------------------------------------------------
# Kernel 1a (BN path): conv matmul (no bias) + fused per-tile (sum, sumsq)
# ---------------------------------------------------------------------------
def _conv_stats_kernel(w_ref, p_ref, y_ref, s1_ref, s2_ref):
    acc = jnp.dot(w_ref[...], p_ref[...],
                  preferred_element_type=jnp.float32)       # (Cout_pad, tm) f32
    y_ref[...] = acc
    ssum = jnp.sum(acc, axis=1, keepdims=True)               # (Cout_pad, 1)
    ssq = jnp.sum(acc * acc, axis=1, keepdims=True)          # (Cout_pad, 1)
    s1_ref[...] = jnp.broadcast_to(ssum, s1_ref.shape)       # lane-dense partials
    s2_ref[...] = jnp.broadcast_to(ssq, s2_ref.shape)


# ---------------------------------------------------------------------------
# Kernel 1b (no-BN path): conv matmul + bias + LeakyReLU, fully fused
# ---------------------------------------------------------------------------
def _conv_bias_act_kernel(w_ref, p_ref, b_ref, o_ref, *, slope):
    acc = jnp.dot(w_ref[...], p_ref[...],
                  preferred_element_type=jnp.float32)
    acc = acc + b_ref[...]                                   # (C,1) broadcast over lanes
    o_ref[...] = jnp.where(acc >= 0, acc, slope * acc)


# ---------------------------------------------------------------------------
# Kernel 2 (BN path): per-channel affine (folded BN) + LeakyReLU
# ---------------------------------------------------------------------------
def _affine_act_kernel(y_ref, sc_ref, sh_ref, o_ref, *, slope):
    y = y_ref[...] * sc_ref[...] + sh_ref[...]
    o_ref[...] = jnp.where(y >= 0, y, slope * y)


# ---------------------------------------------------------------------------
# DownBlock forward (XLA glue: padding, im2col^T, layout; Pallas hot path)
# ---------------------------------------------------------------------------
def down_block_forward(x, conv_w, conv_b, bn_gamma, bn_beta,
                       *, kernel_size, padding, stride, relu_slope,
                       batch_norm, eps=1e-5):
    N, Cin, H, W = x.shape
    Cout = conv_w.shape[0]
    K, s, p = kernel_size, stride, padding
    cfg = _tpu_config()

    # ZeroPad2d + NCHW -> NHWC, bf16 (the MXU still accumulates in f32).
    x_p = jnp.pad(x.astype(jnp.bfloat16), ((0, 0), (0, 0), (p, p), (p, p)))
    x_p = jnp.transpose(x_p, (0, 2, 3, 1))
    Hp, Wp = H + 2 * p, W + 2 * p
    Ho = (Hp - K) // s + 1
    Wo = (Wp - K) // s + 1
    M = N * Ho * Wo
    Kdim = K * K * Cin

    # im2col^T in XLA: rows = features (ki, kj, ci), lanes = output positions m.
    cols = []
    for ki in range(K):
        for kj in range(K):
            cols.append(x_p[:, ki:ki + s * Ho:s, kj:kj + s * Wo:s, :])  # (N,Ho,Wo,Cin)
    pt = jnp.stack(cols, axis=0)                          # (K*K, N, Ho, Wo, Cin)
    pt = jnp.transpose(pt, (0, 4, 1, 2, 3)).reshape(Kdim, M)

    # Cout padded only to the f32 sublane granularity (8), not to 128 lanes.
    Cout_pad = _round_up(Cout, 8)
    tm = _pick_tm(M, Kdim, Cout_pad, cfg)
    Mp = _round_up(M, tm)
    if Mp > M:
        pt = jnp.pad(pt, ((0, 0), (0, Mp - M)))
    num_m = Mp // tm

    # PyTorch conv weight (Cout, Cin, K, K) -> W^T (Cout_pad, K*K*Cin) bf16,
    # feature order (ki, kj, ci) to match patches^T rows.
    w_t = jnp.transpose(conv_w, (0, 2, 3, 1)).reshape(Cout, Kdim)
    w_t = jnp.pad(w_t, ((0, Cout_pad - Cout), (0, 0))).astype(jnp.bfloat16)

    cparams = pltpu.CompilerParams(dimension_semantics=("parallel",),
                                   vmem_limit_bytes=cfg["vmem_limit"])

    w_spec = pl.BlockSpec((Cout_pad, Kdim), lambda i: (0, 0))   # resident across M tiles
    if cfg["big_vmem"] and num_m > 2:
        # Deeper patch buffering where VMEM is plentiful (v5e/v6e) and the grid is long.
        patch_spec = pl.BlockSpec((Kdim, tm), lambda i: (0, i),
                                  pipeline_mode=pl.Buffered(3))
    else:
        patch_spec = pl.BlockSpec((Kdim, tm), lambda i: (0, i))
    y_spec = pl.BlockSpec((Cout_pad, tm), lambda i: (0, i))

    if batch_norm:
        # Conv bias cancels exactly under batch-stat BN -> skip it entirely.
        # Zero-padded M columns then contribute exactly 0 to sum/sumsq.
        y, s1, s2 = pl.pallas_call(
            _conv_stats_kernel,
            out_shape=(jax.ShapeDtypeStruct((Cout_pad, Mp), jnp.float32),
                       jax.ShapeDtypeStruct((num_m * Cout_pad, 128), jnp.float32),
                       jax.ShapeDtypeStruct((num_m * Cout_pad, 128), jnp.float32)),
            grid_spec=pltpu.PrefetchScalarGridSpec(
                num_scalar_prefetch=0, grid=(num_m,),
                in_specs=[w_spec, patch_spec],
                out_specs=(y_spec,
                           pl.BlockSpec((Cout_pad, 128), lambda i: (i, 0)),
                           pl.BlockSpec((Cout_pad, 128), lambda i: (i, 0)))),
            compiler_params=cparams,
        )(w_t, pt)

        ssum = jnp.sum(s1.reshape(num_m, Cout_pad, 128)[:, :, 0], axis=0)
        ssq = jnp.sum(s2.reshape(num_m, Cout_pad, 128)[:, :, 0], axis=0)
        mean = ssum / M
        var = jnp.maximum(ssq / M - mean * mean, 0.0)   # biased var = PyTorch batch stats
        g = jnp.pad(bn_gamma.astype(jnp.float32), (0, Cout_pad - Cout))
        b = jnp.pad(bn_beta.astype(jnp.float32), (0, Cout_pad - Cout))
        inv = jax.lax.rsqrt(var + eps)
        scale = (g * inv).reshape(Cout_pad, 1)
        shift = (b - mean * g * inv).reshape(Cout_pad, 1)

        out_t = pl.pallas_call(
            functools.partial(_affine_act_kernel, slope=relu_slope),
            out_shape=jax.ShapeDtypeStruct((Cout_pad, Mp), jnp.float32),
            grid_spec=pltpu.PrefetchScalarGridSpec(
                num_scalar_prefetch=0, grid=(num_m,),
                in_specs=[y_spec,
                          pl.BlockSpec((Cout_pad, 1), lambda i: (0, 0)),
                          pl.BlockSpec((Cout_pad, 1), lambda i: (0, 0))],
                out_specs=y_spec),
            compiler_params=cparams,
        )(y, scale, shift)
    else:
        bias = jnp.pad(conv_b.astype(jnp.float32),
                       (0, Cout_pad - Cout)).reshape(Cout_pad, 1)
        out_t = pl.pallas_call(
            functools.partial(_conv_bias_act_kernel, slope=relu_slope),
            out_shape=jax.ShapeDtypeStruct((Cout_pad, Mp), jnp.float32),
            grid_spec=pltpu.PrefetchScalarGridSpec(
                num_scalar_prefetch=0, grid=(num_m,),
                in_specs=[w_spec, patch_spec,
                          pl.BlockSpec((Cout_pad, 1), lambda i: (0, 0))],
                out_specs=y_spec),
            compiler_params=cparams,
        )(w_t, pt, bias)

    # (Cout, M) -> NCHW, drop channel / position padding.
    out = out_t[:Cout, :M].reshape(Cout, N, Ho, Wo).transpose(1, 0, 2, 3)
    return out


# ---------------------------------------------------------------------------
# Pure-JAX reference for verification
# ---------------------------------------------------------------------------
def down_block_reference(x, conv_w, conv_b, bn_gamma, bn_beta,
                         *, kernel_size, padding, stride, relu_slope,
                         batch_norm, eps=1e-5):
    p, s = padding, stride
    y = jax.lax.conv_general_dilated(
        x.astype(jnp.float32), conv_w.astype(jnp.float32),
        window_strides=(s, s), padding=[(p, p), (p, p)],
        dimension_numbers=("NCHW", "OIHW", "NCHW"),
    ) + conv_b.astype(jnp.float32)[None, :, None, None]
    if batch_norm:
        mean = jnp.mean(y, axis=(0, 2, 3), keepdims=True)
        var = jnp.mean((y - mean) ** 2, axis=(0, 2, 3), keepdims=True)
        y = (y - mean) * jax.lax.rsqrt(var + eps)
        y = y * bn_gamma[None, :, None, None] + bn_beta[None, :, None, None]
    return jnp.where(y >= 0, y, relu_slope * y)


if __name__ == "__main__":
    # DownBlock(in_channels=4, out_channels=8, kernel_size=3, padding=1,
    #           stride=2, relu_slope=0.1, batch_norm=...)
    N, Cin = 2, 4
    Cout, K, pad, stride = 8, 3, 1, 2
    relu_slope = 0.1

    key = jax.random.PRNGKey(0)
    k1, k2, k3, k4, k5 = jax.random.split(key, 5)
    x_full = jax.random.normal(k1, (N, Cin, 16, 16), dtype=jnp.float32)
    conv_w = jax.random.normal(k2, (Cout, Cin, K, K), dtype=jnp.float32) * 0.1
    conv_b = jax.random.normal(k3, (Cout,), dtype=jnp.float32) * 0.1
    bn_gamma = 1.0 + 0.1 * jax.random.normal(k4, (Cout,), dtype=jnp.float32)
    bn_beta = 0.1 * jax.random.normal(k5, (Cout,), dtype=jnp.float32)

    # (spatial, batch_norm) configs: 16x16 exercises the exact-tile path (BN on/off),
    # 14x14 exercises the zero-padded M tail (stats stay exact without correction).
    for HW, batch_norm in ((16, True), (16, False), (14, True)):
        x = x_full[:, :, :HW, :HW]
        out = down_block_forward(
            x, conv_w, conv_b, bn_gamma, bn_beta,
            kernel_size=K, padding=pad, stride=stride,
            relu_slope=relu_slope, batch_norm=batch_norm)
        out = jax.block_until_ready(out)

        Ho = (HW + 2 * pad - K) // stride + 1
        assert out.shape == (N, Cout, Ho, Ho), out.shape

        # Tight check: reference with the same bf16 rounding of x/w that the
        # kernel feeds the MXU (accumulation stays f32 in both).
        x_bf = x.astype(jnp.bfloat16).astype(jnp.float32)
        w_bf = conv_w.astype(jnp.bfloat16).astype(jnp.float32)
        ref_q = down_block_reference(
            x_bf, w_bf, conv_b, bn_gamma, bn_beta,
            kernel_size=K, padding=pad, stride=stride,
            relu_slope=relu_slope, batch_norm=batch_norm)
        err_q = float(jnp.max(jnp.abs(out - ref_q)))
        assert jnp.allclose(out, ref_q, atol=2e-3, rtol=2e-3), (HW, batch_norm, err_q)

        # Sanity check against the full f32 reference (looser tol: bf16 operands).
        ref = down_block_reference(
            x, conv_w, conv_b, bn_gamma, bn_beta,
            kernel_size=K, padding=pad, stride=stride,
            relu_slope=relu_slope, batch_norm=batch_norm)
        err = float(jnp.max(jnp.abs(out - ref)))
        assert jnp.allclose(out, ref, atol=5e-2, rtol=5e-2), (HW, batch_norm, err)

    print("KERNEL_OK")
</pallas_src>

<mosaic_0001>
module attributes {stable_mosaic.version = 11 : i64} {
  func.func @_conv_stats_kernel(%arg0: i32, %arg1: memref<8x36xbf16, #tpu.memory_space<vmem>>, %arg2: memref<36x128xbf16, #tpu.memory_space<vmem>>, %arg3: memref<8x128xf32, #tpu.memory_space<vmem>>, %arg4: memref<8x128xf32, #tpu.memory_space<vmem>>, %arg5: memref<8x128xf32, #tpu.memory_space<vmem>>) attributes {dimension_semantics = [#tpu.dimension_semantics<parallel>], iteration_bounds = array<i64: 1>, scalar_prefetch = 0 : i64, scratch_operands = 0 : i64, tpu.core_type = #tpu.core_type<tc>, window_params = [{pipeline_mode = #tpu.pipeline_mode<synchronous>, transform_indices = @transform_0, window_bounds = array<i64: 8, 36>}, {transform_indices = @transform_1, window_bounds = array<i64: 36, 128>}, {transform_indices = @transform_2, window_bounds = array<i64: 8, 128>}, {transform_indices = @transform_3, window_bounds = array<i64: 8, 128>}, {transform_indices = @transform_4, window_bounds = array<i64: 8, 128>}]} {
    %c0 = arith.constant 0 : index
    %c0_0 = arith.constant 0 : index
    %0 = vector.load %arg1[%c0, %c0_0] : memref<8x36xbf16, #tpu.memory_space<vmem>>, vector<8x36xbf16>
    %c0_1 = arith.constant 0 : index
    %c0_2 = arith.constant 0 : index
    %1 = vector.load %arg2[%c0_1, %c0_2] : memref<36x128xbf16, #tpu.memory_space<vmem>>, vector<36x128xbf16>
    %cst = arith.constant dense<0.000000e+00> : vector<8x128xf32>
    %2 = tpu.matmul %0, %1, %cst {dimension_numbers = #tpu.dot_dimension_numbers<[1], [0], [0], [1], [0, 0, 1, 1], [], []>} : vector<8x36xbf16>, vector<36x128xbf16>, vector<8x128xf32> -> vector<8x128xf32>
    %c0_3 = arith.constant 0 : index
    %c0_4 = arith.constant 0 : index
    %3 = vector.load %arg3[%c0_3, %c0_4] : memref<8x128xf32, #tpu.memory_space<vmem>>, vector<8x128xf32>
    tpu.vector_store %arg3[%c0_3, %c0_4], %2 {strides = array<i32>} : memref<8x128xf32, #tpu.memory_space<vmem>>, vector<8x128xf32>,
    %cst_5 = arith.constant dense<0.000000e+00> : vector<8xf32>
    %4 = vector.multi_reduction <add>, %2, %cst_5 [1] : vector<8x128xf32> to vector<8xf32>
    %5 = vector.shape_cast %4 : vector<8xf32> to vector<8x1xf32>
    %6 = arith.mulf %2, %2 : vector<8x128xf32>
    %cst_6 = arith.constant dense<0.000000e+00> : vector<8xf32>
    %7 = vector.multi_reduction <add>, %6, %cst_6 [1] : vector<8x128xf32> to vector<8xf32>
    %8 = vector.shape_cast %7 : vector<8xf32> to vector<8x1xf32>
    %9 = vector.shape_cast %5 : vector<8x1xf32> to vector<8x1xf32>
    %10 = vector.broadcast %9 : vector<8x1xf32> to vector<8x128xf32>
    %c0_7 = arith.constant 0 : index
    %c0_8 = arith.constant 0 : index
    %11 = vector.load %arg4[%c0_7, %c0_8] : memref<8x128xf32, #tpu.memory_space<vmem>>, vector<8x128xf32>
    tpu.vector_store %arg4[%c0_7, %c0_8], %10 {strides = array<i32>} : memref<8x128xf32, #tpu.memory_space<vmem>>, vector<8x128xf32>,
    %12 = vector.shape_cast %8 : vector<8x1xf32> to vector<8x1xf32>
    %13 = vector.broadcast %12 : vector<8x1xf32> to vector<8x128xf32>
    %c0_9 = arith.constant 0 : index
    %c0_10 = arith.constant 0 : index
    %14 = vector.load %arg5[%c0_9, %c0_10] : memref<8x128xf32, #tpu.memory_space<vmem>>, vector<8x128xf32>
    tpu.vector_store %arg5[%c0_9, %c0_10], %13 {strides = array<i32>} : memref<8x128xf32, #tpu.memory_space<vmem>>, vector<8x128xf32>,
    return
  }
  func.func @transform_0(%arg0: i32) -> (i32, i32) {
    %c0_i32 = arith.constant 0 : i32
    %c0_i32_0 = arith.constant 0 : i32
    %c0_i32_1 = arith.constant 0 : i32
    return %c0_i32, %c0_i32_0 : i32, i32
  }
  func.func @transform_1(%arg0: i32) -> (i32, i32) {
    %c0_i32 = arith.constant 0 : i32
    %c0_i32_0 = arith.constant 0 : i32
    return %c0_i32, %arg0 : i32, i32
  }
  func.func @transform_2(%arg0: i32) -> (i32, i32) {
    %c0_i32 = arith.constant 0 : i32
    %c0_i32_0 = arith.constant 0 : i32
    return %c0_i32, %arg0 : i32, i32
  }
  func.func @transform_3(%arg0: i32) -> (i32, i32) {
    %c0_i32 = arith.constant 0 : i32
    %c0_i32_0 = arith.constant 0 : i32
    return %arg0, %c0_i32 : i32, i32
  }
  func.func @transform_4(%arg0: i32) -> (i32, i32) {
    %c0_i32 = arith.constant 0 : i32
    %c0_i32_0 = arith.constant 0 : i32
    return %arg0, %c0_i32 : i32, i32
  }
}

</mosaic_0001>

<bundles_post_ra>
// kernel: tpu_custom_call.1
= control target key start
LH: loop header
LB: loop body
LE: loop exit
PB: predicated region body
PF: predicated region fallthrough
CT: control target
= control target key end

     0   :  { %10 = vsyncpa [#allocation3], 0  ;;  %s339_s0 = inlined_call_operand.hbm [shape: bf16[8,36], index: 0, kind: input, shape index: {}]   ;;  %s340_s1 = inlined_call_operand.hbm [shape: bf16[36,128], index: 1, kind: input, shape index: {}]   ;;  %s341_s2 = inlined_call_operand.hbm [shape: f32[8,128], index: 2, kind: output, shape index: {0}]   ;;  %s342_s3 = inlined_call_operand.hbm [shape: f32[8,128], index: 3, kind: output, shape index: {1}]   ;;  %s343_s4 = inlined_call_operand.hbm [shape: f32[8,128], index: 4, kind: output, shape index: {2}]  }
   0x1   :  { %11 = vsyncpa [#allocation6], 0 }
   0x2   :  { %12 = vsyncpa [#allocation4], 0 }
   0x3   :  { %13 = vsyncpa [#allocation9], 0  ;;  %s19_s17 = sshll.u32 %s339_s0, 4  ;;  %s292_s18 = smov [#allocation2]   ;;  %s20_s17 = int_to_ptr.hbm [resolvable:$true] %s19_s17 }
   0x4   :  { %s21_s19 = sshll.u32 %s292_s18, 4  ;;  %s29_s22 = sshll.u32 %s340_s1, 4  ;;  %s22_s19 = int_to_ptr.vmem [resolvable:$true] %s21_s19  ;;  %s30_s22 = int_to_ptr.hbm [resolvable:$true] %s29_s22 }
   0x5   :  { %24 = dma.hbm_to_vmem [thread:$0]  %s20_s17, 64, %s22_s19, [#allocation3]  }
   0x6   :  { %s293_s23 = smov [#allocation5]   ;;  %s294_s25 = smov 64  }
   0x7   :  { %s31_s24 = sshll.u32 %s293_s23, 4  ;;  %s295_s26 = smov 4   ;;  %s32_s24 = int_to_ptr.vmem [resolvable:$true] %s31_s24 }
   0x8   :  { %37 = dma.hbm_to_vmem [thread:$0]  %s30_s22, 320, %s32_s24, [#allocation6], %s294_s25, %s294_s25, %s295_s26  }
   0x9   :  { %284 = dma.done.wait [#allocation3], 64  }
   0xa   :  { %285 = vsyncadd [#allocation3], 4294967232 }
   0xb   :  { %286 = dma.done.wait [#allocation6], 320  }
   0xc   :  { %287 = vsyncadd [#allocation6], 4294966976  ;;  %v52_v0 = vld [vmem:[#allocation5 + $0x10] sm:$0x3]  ;;  %vm72_vm0 = vcmask 1041408   ;;  %v156_v4 = vld [vmem:[#allocation5 + $0x8] sm:$0xff] }
   0xd   :  { %v62_v1 = vunpack.c.l.b16 %v52_v0  ;;  %v155_v5 = vld [vmem:[#allocation5] sm:$0xff]  ;;  %v47_v6 = vld [vmem:[#allocation2] sm:$0xf]  ;;  %vm68_vm1 = vcmask 293888   ;;  %s104_s27 = sshll.u32 %s341_s2, 4  ;;  %s296_s28 = smov [#allocation7]   ;;  %s105_s27 = int_to_ptr.hbm [resolvable:$true] %s104_s27 }
   0xe   :  { %s102_s29 = sshll.u32 %s296_s28, 4  ;;  %s297_s30 = smov [#allocation8]   ;;  %s103_s29 = int_to_ptr.vmem [resolvable:$true] %s102_s29 }
   0xf   :  { %v65_v2 = vpack.c.b16 %v62_v1, %v62_v1  ;;  %s113_s5 = sshll.u32 %s297_s30, 4  ;;  %s115_s8 = sshll.u32 %s342_s3, 4  ;;  %s114_s5 = int_to_ptr.vmem [resolvable:$true] %s113_s5  ;;  %s116_s8 = int_to_ptr.hbm [resolvable:$true] %s115_s8 }
  0x10   :  { %s298_s2 = smov [#allocation10]   ;;  %s126_s12 = sshll.u32 %s343_s4, 4  ;;  %s127_s12 = int_to_ptr.hbm [resolvable:$true] %s126_s12 }
  0x11   :  { %v74_v3 = vsel %vm72_vm0, %v65_v2, 0  ;;  %s124_s9 = sshll.u32 %s298_s2, 4  ;;  %s125_s9 = int_to_ptr.vmem [resolvable:$true] %s124_s9 }
  0x12   :  { %81 = vmatpush.bf16.msra.mxu0 %v74_v3 }
  0x16   :  { %82 = vmatpush.bf16.msra.mxu0 %v156_v4 }
  0x1a   :  { %83 = vmatpush.bf16.msra.mxu0 %v155_v5 }
  0x1d   :  { %154 = vmatmul.msk.bf16.vlgmr.msra.gmra.mxu0 %vm68_vm1, %v47_v6 }
  0x9a   :  { %v85_v7 = vpop.f32.mrf.mxu0 }
  0x9b   :  { %89 = vst [vmem:[#allocation7] sm:$0xff] %v85_v7  ;;  %90 = vadd.xlane.f32.xlu0 %v85_v7  ;;  %v92_v8 = vmul.f32 %v85_v7, %v85_v7 }
  0x9c   :  { %107 = dma.vmem_to_hbm [thread:$0]  %s103_s29, 128, %s105_s27, [#allocation4]  }
  0xa2   :  { %v87_v9 = vpop.f32.mrf.mxu0 }
  0xa3   :  { %93 = vadd.xlane.f32.xlu0 %v92_v8 }
 0x10e   :  { %v91_v10 = vpop.xlane.xlu0 %90 }
 0x10f   :  { %95 = vst [vmem:[#allocation8] sm:$0xff] %v91_v10 }
 0x110   :  { %118 = dma.vmem_to_hbm [thread:$0]  %s114_s5, 128, %s116_s8, [#allocation9]  }
 0x116   :  { %v94_v11 = vpop.xlane.xlu0 %93 }
 0x117   :  { %96 = vst [vmem:[#allocation10] sm:$0xff] %v94_v11 }
 0x118   :  { %129 = dma.vmem_to_hbm [thread:$0]  %s125_s9, 128, %s127_s12, [#allocation9]  }
 0x119   :  { %288 = dma.done.wait [#allocation4], 128  }
 0x11a   :  { %289 = vsyncadd [#allocation4], 4294967168 }
 0x11b   :  { %290 = dma.done.wait [#allocation9], 256  }
 0x11c   :  { %291 = vsyncadd [#allocation9], 4294967040 }
 0x11d   :  { %142 = vsyncpa [#allocation3], 1 }
 0x11e   :  { %143 = vsyncpa [#allocation6], 1 }
 0x11f   :  { %144 = vsyncpa [#allocation4], 1 }
 0x120   :  { %145 = vsyncpa [#allocation9], 1 }

</bundles_post_ra>
